<compile_context>
chip_gen: v7x
topology: tpu7x:2x2x1
jax: 0.10.0
libtpu: 0.0.40
codegen_flags: <defaults>
</compile_context>

<pallas_src>
import functools

import jax
import jax.numpy as jnp
from jax.experimental import pallas as pl
from jax.experimental.pallas import tpu as pltpu


# ---------------------------------------------------------------------------
# VMEM budgeting / batch-tile picking
# ---------------------------------------------------------------------------
def _vmem_capacity_bytes():
    try:
        return int(pltpu.get_tpu_info().vmem_capacity_bytes)
    except Exception:
        return 64 * 1024 * 1024   # conservative: v7x per-TensorCore VMEM


def _per_graph_vmem_bytes(n_nodes, d_in, d_out, n_keep):
    f32 = 4
    d_c = d_out + 1
    a = n_nodes * n_nodes * f32
    x = n_nodes * d_in * f32
    inter = n_nodes * d_in * f32            # AX (or XW)
    inter += n_nodes * d_c * f32            # H
    inter += n_nodes * d_out * f32          # x_feat
    inter += 2 * n_keep * n_nodes * f32     # P, AP
    outs = (n_keep * n_keep + n_keep * d_out) * f32
    # BlockSpec double-buffers every input and output block (x2).
    return 2 * (a + x) + 2 * outs + inter


def _pick_block_b(batch, per_graph_bytes, budget_bytes, min_grid=2):
    divisors = [c for c in range(1, batch + 1) if batch % c == 0]
    fitting = [c for c in divisors if c * per_graph_bytes <= budget_bytes]
    if not fitting:
        # TODO(synk): needs node-axis tiling of A (K-accumulated AX) here.
        raise NotImplementedError(
            "a single graph's A tile exceeds the VMEM budget; node-axis "
            "tiling is required for this problem size")
    # Prefer >= min_grid steps (v7x megacore sharding + pipeline overlap),
    # then the biggest tile that fits (amortizes ~0.35us/step overhead).
    preferred = [c for c in fitting if batch // c >= min_grid]
    return max(preferred) if preferred else max(fitting)


# ---------------------------------------------------------------------------
# Fused kernel: bmm, [model|rank] linear, leaky_relu, top-k, one-hot gather.
# ---------------------------------------------------------------------------
def _sagpool_fused_kernel(a_ref, x_ref, w_ref, b_ref, aout_ref, xout_ref,
                          *, bt, n_nodes, d_in, d_c, d_out, n_keep, mxu_dtype):
    f32 = jnp.float32
    exact = jax.lax.Precision.HIGHEST
    prec = exact if mxu_dtype == jnp.float32 else jax.lax.Precision.DEFAULT

    A = a_ref[...]                                     # (Bt, N, N)   f32
    X = x_ref[...]                                     # (Bt, N, Din) f32
    W = w_ref[...]                                     # (Din, Dc) = [Wm | Wr]
    bias = b_ref[...]                                  # (1, Dc)   = [bm | br]

    # ---- fused [model | rank] linear applied to bmm(A, X) -------------------
    if d_c < d_in:
        # Reassociate: A @ (X @ Wc) costs fewer MXU FLOPs when the head is
        # narrower than the input features (not taken for the demo shapes).
        XW = jnp.dot(X.reshape(bt * n_nodes, d_in).astype(mxu_dtype),
                     W.astype(mxu_dtype),
                     precision=prec, preferred_element_type=f32)
        XW3 = XW.reshape(bt, n_nodes, d_c)
        H3 = jnp.einsum("bij,bjc->bic", A.astype(mxu_dtype),
                        XW3.astype(mxu_dtype),
                        precision=prec, preferred_element_type=f32) + bias
        H = H3.reshape(bt * n_nodes, d_c)
    else:
        AX = jnp.einsum("bij,bjd->bid", A.astype(mxu_dtype),
                        X.astype(mxu_dtype),
                        precision=prec, preferred_element_type=f32)
        # N is a multiple of 8 in practice, so this leading-dim collapse is a
        # pure relayout (no VMEM copy).
        H = jnp.dot(AX.reshape(bt * n_nodes, d_in), W,
                    precision=prec, preferred_element_type=f32) + bias

    # ---- model head: leaky_relu (torch default slope 0.01) ------------------
    hm = H[:, :d_out]
    hm = jnp.where(hm > 0, hm, 0.01 * hm)
    x_feat = hm.reshape(bt, n_nodes, d_out)            # (Bt, N, Dout)

    # ---- rank head -> in-kernel top-k ----------------------------------------
    # softmax is strictly monotone per row and only feeds the sort, so top-k
    # over the raw rank logits selects exactly the same nodes.
    logits = H[:, d_out:d_c].reshape(bt, n_nodes, 1)   # (Bt, N, 1)
    sub_iota = jax.lax.broadcasted_iota(jnp.int32, (bt, n_nodes, 1), 1)
    lane_iota = jax.lax.broadcasted_iota(jnp.int32, (bt, 1, n_nodes), 2)
    neg_big = jnp.float32(jnp.finfo(jnp.float32).min)

    work = logits
    rows = []
    for _ in range(n_keep):                            # n_keep small & static
        cur_max = jnp.max(work, axis=1, keepdims=True)               # (Bt,1,1)
        hit = work >= cur_max
        idx = jnp.min(jnp.where(hit, sub_iota, n_nodes), axis=1,
                      keepdims=True)                                 # (Bt,1,1)
        rows.append((lane_iota == idx).astype(f32))                  # (Bt,1,N)
        work = jnp.where(sub_iota == idx, neg_big, work)
    P = jnp.concatenate(rows, axis=1)                                # (Bt,n,N)

    # ---- gather via one-hot selection matmuls (exact: P is 0/1, HIGHEST) ----
    xout_ref[...] = jnp.einsum(
        "bin,bnd->bid", P, x_feat,
        precision=exact, preferred_element_type=f32).astype(xout_ref.dtype)

    AP = jnp.einsum("bin,bnm->bim", P, A,
                    precision=exact, preferred_element_type=f32)     # (Bt,n,N)
    # torch: row-gather -> transpose -> row-gather
    #   => A_out[b, i, j] = A[b, topk[j], topk[i]]
    aout_ref[...] = jnp.einsum(
        "bim,bjm->bij", P, AP,
        precision=exact, preferred_element_type=f32).astype(aout_ref.dtype)


def sagpool_fused(A, X, Wc, bc, n_keep, *, block_b=None,
                  mxu_dtype=jnp.float32):
    """Single pallas_call: returns (A_out (B, n, n), x_out (B, n, Dout))."""
    B, N, Din = X.shape
    Dc = Wc.shape[1]
    Dout = Dc - 1

    cap = _vmem_capacity_bytes()
    vmem_limit = min((cap * 3) // 4, 112 * 1024 * 1024)
    if block_b is None:
        per_graph = _per_graph_vmem_bytes(N, Din, Dout, n_keep)
        block_b = _pick_block_b(B, per_graph, (vmem_limit * 3) // 4)
    assert B % block_b == 0

    kernel = functools.partial(
        _sagpool_fused_kernel, bt=block_b, n_nodes=N, d_in=Din, d_c=Dc,
        d_out=Dout, n_keep=n_keep, mxu_dtype=mxu_dtype)

    grid_spec = pltpu.PrefetchScalarGridSpec(
        num_scalar_prefetch=0,
        grid=(B // block_b,),
        in_specs=[
            pl.BlockSpec((block_b, N, N), lambda b: (b, 0, 0)),      # A
            pl.BlockSpec((block_b, N, Din), lambda b: (b, 0, 0)),    # X
            pl.BlockSpec((Din, Dc), lambda b: (0, 0)),               # [Wm | Wr]
            pl.BlockSpec((1, Dc), lambda b: (0, 0)),                 # [bm | br]
        ],
        out_specs=[
            pl.BlockSpec((block_b, n_keep, n_keep), lambda b: (b, 0, 0)),
            pl.BlockSpec((block_b, n_keep, Dout), lambda b: (b, 0, 0)),
        ],
    )

    return pl.pallas_call(
        kernel,
        out_shape=(
            jax.ShapeDtypeStruct((B, n_keep, n_keep), jnp.float32),
            jax.ShapeDtypeStruct((B, n_keep, Dout), jnp.float32),
        ),
        grid_spec=grid_spec,
        compiler_params=pltpu.CompilerParams(
            # batch-tile axis is independent -> sharded across both TCs (v7x)
            dimension_semantics=("parallel",),
            vmem_limit_bytes=vmem_limit,
        ),
    )(A, X, Wc, bc)


# ---------------------------------------------------------------------------
# Full forward (mirrors SAGPool.forward).
# ---------------------------------------------------------------------------
def sagpool_forward(A, X, params, n):
    Wm_t, bm, Wr_t, br = params
    # Pack the rank head as one extra output column of the model head so the
    # kernel runs a single fused linear.
    Wc = jnp.concatenate([Wm_t, Wr_t], axis=1)          # (Din, Dout + 1)
    bc = jnp.concatenate([bm, br], axis=1)               # (1, Dout + 1)
    return sagpool_fused(A, X, Wc, bc, n)


# ---------------------------------------------------------------------------
# Pure-JAX reference mirroring the PyTorch module.
# ---------------------------------------------------------------------------
def _reference(A, X, params, n):
    hp = jax.lax.Precision.HIGHEST
    Wm_t, bm, Wr_t, br = params
    B = X.shape[0]
    AX = jnp.einsum("bij,bjd->bid", A, X, precision=hp)
    h = jnp.einsum("bnd,do->bno", AX, Wm_t, precision=hp) + bm
    x_out = jnp.where(h > 0, h, 0.01 * h)
    logits = jnp.einsum("bnd,do->bno", AX, Wr_t, precision=hp) + br  # (B,N,1)
    score = jax.nn.softmax(logits, axis=1)
    score = jnp.squeeze(score, axis=-1)
    _, topk = jax.lax.top_k(score, n)
    bat_id = jnp.arange(B)[:, None]
    x_sel = x_out[bat_id, topk]
    A_sel = A[bat_id, topk]
    A_sel = jnp.transpose(A_sel, (0, 2, 1))
    A_sel = A_sel[bat_id, topk]
    return A_sel, x_sel


if __name__ == "__main__":
    # Small shapes consistent with the module's forward:
    #   A: (B, N, N), X: (B, N, D_in); Linear(D_in -> D_out), Linear(D_in -> 1)
    B, N, D_in, D_out, n = 2, 16, 8, 32, 4

    key = jax.random.PRNGKey(0)
    k_a, k_x, k_wm, k_bm, k_wr, k_br = jax.random.split(key, 6)

    A = jax.random.uniform(k_a, (B, N, N), dtype=jnp.float32)
    X = jax.random.normal(k_x, (B, N, D_in), dtype=jnp.float32)

    # PyTorch Linear-style init U(-1/sqrt(in), 1/sqrt(in)); weights stored
    # pre-transposed as (D_in, D_out) / (D_in, 1).
    bound = 1.0 / (D_in ** 0.5)
    Wm_t = jax.random.uniform(k_wm, (D_in, D_out), jnp.float32, -bound, bound)
    bm = jax.random.uniform(k_bm, (1, D_out), jnp.float32, -bound, bound)
    Wr_t = jax.random.uniform(k_wr, (D_in, 1), jnp.float32, -bound, bound)
    br = jax.random.uniform(k_br, (1, 1), jnp.float32, -bound, bound)
    params = (Wm_t, bm, Wr_t, br)

    fwd = jax.jit(sagpool_forward, static_argnums=(3,))
    A_out, x_out = fwd(A, X, params, n)
    jax.block_until_ready((A_out, x_out))

    A_ref, x_ref = _reference(A, X, params, n)
    assert A_out.shape == (B, n, n) and x_out.shape == (B, n, D_out)
    assert jnp.allclose(A_out, A_ref, atol=1e-4, rtol=1e-4)
    assert jnp.allclose(x_out, x_ref, atol=1e-4, rtol=1e-4)

    print("KERNEL_OK")
</pallas_src>

<mosaic_0001>
module attributes {stable_mosaic.version = 11 : i64} {
  func.func @_sagpool_fused_kernel(%arg0: i32, %arg1: memref<1x16x16xf32, #tpu.memory_space<vmem>>, %arg2: memref<1x16x8xf32, #tpu.memory_space<vmem>>, %arg3: memref<8x33xf32, #tpu.memory_space<vmem>>, %arg4: memref<1x33xf32, #tpu.memory_space<vmem>>, %arg5: memref<1x4x4xf32, #tpu.memory_space<vmem>>, %arg6: memref<1x4x32xf32, #tpu.memory_space<vmem>>) attributes {dimension_semantics = [#tpu.dimension_semantics<parallel>], iteration_bounds = array<i64: 2>, scalar_prefetch = 0 : i64, scratch_operands = 0 : i64, tpu.core_type = #tpu.core_type<tc>, window_params = [{transform_indices = @transform_0, window_bounds = array<i64: 1, 16, 16>}, {transform_indices = @transform_1, window_bounds = array<i64: 1, 16, 8>}, {pipeline_mode = #tpu.pipeline_mode<synchronous>, transform_indices = @transform_2, window_bounds = array<i64: 8, 33>}, {pipeline_mode = #tpu.pipeline_mode<synchronous>, transform_indices = @transform_3, window_bounds = array<i64: 1, 33>}, {transform_indices = @transform_4, window_bounds = array<i64: 1, 4, 4>}, {transform_indices = @transform_5, window_bounds = array<i64: 1, 4, 32>}]} {
    %c0 = arith.constant 0 : index
    %c0_0 = arith.constant 0 : index
    %c0_1 = arith.constant 0 : index
    %0 = vector.load %arg1[%c0, %c0_0, %c0_1] : memref<1x16x16xf32, #tpu.memory_space<vmem>>, vector<1x16x16xf32>
    %c0_2 = arith.constant 0 : index
    %c0_3 = arith.constant 0 : index
    %c0_4 = arith.constant 0 : index
    %1 = vector.load %arg2[%c0_2, %c0_3, %c0_4] : memref<1x16x8xf32, #tpu.memory_space<vmem>>, vector<1x16x8xf32>
    %c0_5 = arith.constant 0 : index
    %c0_6 = arith.constant 0 : index
    %2 = vector.load %arg3[%c0_5, %c0_6] : memref<8x33xf32, #tpu.memory_space<vmem>>, vector<8x33xf32>
    %c0_7 = arith.constant 0 : index
    %c0_8 = arith.constant 0 : index
    %3 = vector.load %arg4[%c0_7, %c0_8] : memref<1x33xf32, #tpu.memory_space<vmem>>, vector<1x33xf32>
    "tpu.trace_start"() <{level = 10 : i32, message = "bij,bjd->bid"}> : () -> ()
    %cst = arith.constant dense<0.000000e+00> : vector<1x16x8xf32>
    %4 = tpu.matmul %0, %1, %cst {dimension_numbers = #tpu.dot_dimension_numbers<[2], [1], [1], [2], [0, 0, 0, 1, 1, 2], [0], [0]>, precision = #tpu.contract_precision<fp32>} : vector<1x16x16xf32>, vector<1x16x8xf32>, vector<1x16x8xf32> -> vector<1x16x8xf32>
    "tpu.trace_stop"() : () -> ()
    %5 = vector.shape_cast %4 : vector<1x16x8xf32> to vector<16x8xf32>
    %cst_9 = arith.constant dense<0.000000e+00> : vector<16x33xf32>
    %6 = tpu.matmul %5, %2, %cst_9 {dimension_numbers = #tpu.dot_dimension_numbers<[1], [0], [0], [1], [0, 0, 1, 1], [], []>, precision = #tpu.contract_precision<fp32>} : vector<16x8xf32>, vector<8x33xf32>, vector<16x33xf32> -> vector<16x33xf32>
    %7 = vector.broadcast %3 : vector<1x33xf32> to vector<16x33xf32>
    %8 = arith.addf %6, %7 : vector<16x33xf32>
    %9 = vector.extract_strided_slice %8 {offsets = [0, 0], sizes = [16, 32], strides = [1, 1]} : vector<16x33xf32> to vector<16x32xf32>
    %cst_10 = arith.constant 0.000000e+00 : f32
    %10 = vector.broadcast %cst_10 : f32 to vector<16x32xf32>
    %11 = arith.cmpf ogt, %9, %10 : vector<16x32xf32>
    %cst_11 = arith.constant 0.00999999977 : f32
    %12 = vector.broadcast %cst_11 : f32 to vector<16x32xf32>
    %13 = arith.mulf %12, %9 : vector<16x32xf32>
    %14 = arith.select %11, %9, %13 : vector<16x32xi1>, vector<16x32xf32>
    %15 = vector.shape_cast %14 : vector<16x32xf32> to vector<1x16x32xf32>
    %16 = vector.extract_strided_slice %8 {offsets = [0, 32], sizes = [16, 1], strides = [1, 1]} : vector<16x33xf32> to vector<16x1xf32>
    %17 = vector.shape_cast %16 : vector<16x1xf32> to vector<1x16x1xf32>
    %18 = tpu.iota {dimensions = array<i32: 1>} : vector<1x16x1xi32>
    %19 = tpu.iota {dimensions = array<i32: 2>} : vector<1x1x16xi32>
    %cst_12 = arith.constant dense<0xFF800000> : vector<1x1xf32>
    %20 = vector.multi_reduction <maximumf>, %17, %cst_12 [1] : vector<1x16x1xf32> to vector<1x1xf32>
    %21 = vector.shape_cast %20 : vector<1x1xf32> to vector<1x1x1xf32>
    %22 = vector.broadcast %21 : vector<1x1x1xf32> to vector<1x16x1xf32>
    %23 = arith.cmpf oge, %17, %22 : vector<1x16x1xf32>
    %c16_i32 = arith.constant 16 : i32
    %24 = vector.broadcast %c16_i32 : i32 to vector<1x16x1xi32>
    %25 = arith.select %23, %18, %24 : vector<1x16x1xi1>, vector<1x16x1xi32>
    %cst_13 = arith.constant dense<2147483647> : vector<1x1xi32>
    %26 = vector.multi_reduction <minsi>, %25, %cst_13 [1] : vector<1x16x1xi32> to vector<1x1xi32>
    %27 = vector.shape_cast %26 : vector<1x1xi32> to vector<1x1x1xi32>
    %28 = vector.broadcast %27 : vector<1x1x1xi32> to vector<1x1x16xi32>
    %29 = arith.cmpi eq, %19, %28 : vector<1x1x16xi32>
    %30 = arith.extui %29 : vector<1x1x16xi1> to vector<1x1x16xi32>
    %31 = arith.sitofp %30 : vector<1x1x16xi32> to vector<1x1x16xf32>
    %32 = vector.broadcast %27 : vector<1x1x1xi32> to vector<1x16x1xi32>
    %33 = arith.cmpi eq, %18, %32 : vector<1x16x1xi32>
    %cst_14 = arith.constant -3.40282347E+38 : f32
    %34 = vector.broadcast %cst_14 : f32 to vector<1x16x1xf32>
    %35 = arith.select %33, %34, %17 : vector<1x16x1xi1>, vector<1x16x1xf32>
    %cst_15 = arith.constant dense<0xFF800000> : vector<1x1xf32>
    %36 = vector.multi_reduction <maximumf>, %35, %cst_15 [1] : vector<1x16x1xf32> to vector<1x1xf32>
    %37 = vector.shape_cast %36 : vector<1x1xf32> to vector<1x1x1xf32>
    %38 = vector.broadcast %37 : vector<1x1x1xf32> to vector<1x16x1xf32>
    %39 = arith.cmpf oge, %35, %38 : vector<1x16x1xf32>
    %c16_i32_16 = arith.constant 16 : i32
    %40 = vector.broadcast %c16_i32_16 : i32 to vector<1x16x1xi32>
    %41 = arith.select %39, %18, %40 : vector<1x16x1xi1>, vector<1x16x1xi32>
    %cst_17 = arith.constant dense<2147483647> : vector<1x1xi32>
    %42 = vector.multi_reduction <minsi>, %41, %cst_17 [1] : vector<1x16x1xi32> to vector<1x1xi32>
    %43 = vector.shape_cast %42 : vector<1x1xi32> to vector<1x1x1xi32>
    %44 = vector.broadcast %43 : vector<1x1x1xi32> to vector<1x1x16xi32>
    %45 = arith.cmpi eq, %19, %44 : vector<1x1x16xi32>
    %46 = arith.extui %45 : vector<1x1x16xi1> to vector<1x1x16xi32>
    %47 = arith.sitofp %46 : vector<1x1x16xi32> to vector<1x1x16xf32>
    %48 = vector.broadcast %43 : vector<1x1x1xi32> to vector<1x16x1xi32>
    %49 = arith.cmpi eq, %18, %48 : vector<1x16x1xi32>
    %cst_18 = arith.constant -3.40282347E+38 : f32
    %50 = vector.broadcast %cst_18 : f32 to vector<1x16x1xf32>
    %51 = arith.select %49, %50, %35 : vector<1x16x1xi1>, vector<1x16x1xf32>
    %cst_19 = arith.constant dense<0xFF800000> : vector<1x1xf32>
    %52 = vector.multi_reduction <maximumf>, %51, %cst_19 [1] : vector<1x16x1xf32> to vector<1x1xf32>
    %53 = vector.shape_cast %52 : vector<1x1xf32> to vector<1x1x1xf32>
    %54 = vector.broadcast %53 : vector<1x1x1xf32> to vector<1x16x1xf32>
    %55 = arith.cmpf oge, %51, %54 : vector<1x16x1xf32>
    %c16_i32_20 = arith.constant 16 : i32
    %56 = vector.broadcast %c16_i32_20 : i32 to vector<1x16x1xi32>
    %57 = arith.select %55, %18, %56 : vector<1x16x1xi1>, vector<1x16x1xi32>
    %cst_21 = arith.constant dense<2147483647> : vector<1x1xi32>
    %58 = vector.multi_reduction <minsi>, %57, %cst_21 [1] : vector<1x16x1xi32> to vector<1x1xi32>
    %59 = vector.shape_cast %58 : vector<1x1xi32> to vector<1x1x1xi32>
    %60 = vector.broadcast %59 : vector<1x1x1xi32> to vector<1x1x16xi32>
    %61 = arith.cmpi eq, %19, %60 : vector<1x1x16xi32>
    %62 = arith.extui %61 : vector<1x1x16xi1> to vector<1x1x16xi32>
    %63 = arith.sitofp %62 : vector<1x1x16xi32> to vector<1x1x16xf32>
    %64 = vector.broadcast %59 : vector<1x1x1xi32> to vector<1x16x1xi32>
    %65 = arith.cmpi eq, %18, %64 : vector<1x16x1xi32>
    %cst_22 = arith.constant -3.40282347E+38 : f32
    %66 = vector.broadcast %cst_22 : f32 to vector<1x16x1xf32>
    %67 = arith.select %65, %66, %51 : vector<1x16x1xi1>, vector<1x16x1xf32>
    %cst_23 = arith.constant dense<0xFF800000> : vector<1x1xf32>
    %68 = vector.multi_reduction <maximumf>, %67, %cst_23 [1] : vector<1x16x1xf32> to vector<1x1xf32>
    %69 = vector.shape_cast %68 : vector<1x1xf32> to vector<1x1x1xf32>
    %70 = vector.broadcast %69 : vector<1x1x1xf32> to vector<1x16x1xf32>
    %71 = arith.cmpf oge, %67, %70 : vector<1x16x1xf32>
    %c16_i32_24 = arith.constant 16 : i32
    %72 = vector.broadcast %c16_i32_24 : i32 to vector<1x16x1xi32>
    %73 = arith.select %71, %18, %72 : vector<1x16x1xi1>, vector<1x16x1xi32>
    %cst_25 = arith.constant dense<2147483647> : vector<1x1xi32>
    %74 = vector.multi_reduction <minsi>, %73, %cst_25 [1] : vector<1x16x1xi32> to vector<1x1xi32>
    %75 = vector.shape_cast %74 : vector<1x1xi32> to vector<1x1x1xi32>
    %76 = vector.broadcast %75 : vector<1x1x1xi32> to vector<1x1x16xi32>
    %77 = arith.cmpi eq, %19, %76 : vector<1x1x16xi32>
    %78 = arith.extui %77 : vector<1x1x16xi1> to vector<1x1x16xi32>
    %79 = arith.sitofp %78 : vector<1x1x16xi32> to vector<1x1x16xf32>
    %80 = tpu.concatenate %31, %47, %63, %79 in 1 : vector<1x1x16xf32>, vector<1x1x16xf32>, vector<1x1x16xf32>, vector<1x1x16xf32> -> vector<1x4x16xf32>
    "tpu.trace_start"() <{level = 10 : i32, message = "bin,bnd->bid"}> : () -> ()
    %cst_26 = arith.constant dense<0.000000e+00> : vector<1x4x32xf32>
    %81 = tpu.matmul %80, %15, %cst_26 {dimension_numbers = #tpu.dot_dimension_numbers<[2], [1], [1], [2], [0, 0, 0, 1, 1, 2], [0], [0]>, precision = #tpu.contract_precision<fp32>} : vector<1x4x16xf32>, vector<1x16x32xf32>, vector<1x4x32xf32> -> vector<1x4x32xf32>
    "tpu.trace_stop"() : () -> ()
    %c0_27 = arith.constant 0 : index
    %c0_28 = arith.constant 0 : index
    %c0_29 = arith.constant 0 : index
    %82 = vector.load %arg6[%c0_27, %c0_28, %c0_29] : memref<1x4x32xf32, #tpu.memory_space<vmem>>, vector<1x4x32xf32>
    tpu.vector_store %arg6[%c0_27, %c0_28, %c0_29], %81 {strides = array<i32>} : memref<1x4x32xf32, #tpu.memory_space<vmem>>, vector<1x4x32xf32>,
    "tpu.trace_start"() <{level = 10 : i32, message = "bin,bnm->bim"}> : () -> ()
    %cst_30 = arith.constant dense<0.000000e+00> : vector<1x4x16xf32>
    %83 = tpu.matmul %80, %0, %cst_30 {dimension_numbers = #tpu.dot_dimension_numbers<[2], [1], [1], [2], [0, 0, 0, 1, 1, 2], [0], [0]>, precision = #tpu.contract_precision<fp32>} : vector<1x4x16xf32>, vector<1x16x16xf32>, vector<1x4x16xf32> -> vector<1x4x16xf32>
    "tpu.trace_stop"() : () -> ()
    "tpu.trace_start"() <{level = 10 : i32, message = "bim,bjm->bij"}> : () -> ()
    %cst_31 = arith.constant dense<0.000000e+00> : vector<1x4x4xf32>
    %84 = tpu.matmul %80, %83, %cst_31 {dimension_numbers = #tpu.dot_dimension_numbers<[2], [2], [1], [1], [0, 0, 0, 1, 1, 1], [0], [0]>, precision = #tpu.contract_precision<fp32>} : vector<1x4x16xf32>, vector<1x4x16xf32>, vector<1x4x4xf32> -> vector<1x4x4xf32>
    "tpu.trace_stop"() : () -> ()
    %c0_32 = arith.constant 0 : index
    %c0_33 = arith.constant 0 : index
    %c0_34 = arith.constant 0 : index
    %85 = vector.load %arg5[%c0_32, %c0_33, %c0_34] : memref<1x4x4xf32, #tpu.memory_space<vmem>>, vector<1x4x4xf32>
    tpu.vector_store %arg5[%c0_32, %c0_33, %c0_34], %84 {strides = array<i32>} : memref<1x4x4xf32, #tpu.memory_space<vmem>>, vector<1x4x4xf32>,
    return
  }
  func.func @transform_0(%arg0: i32) -> (i32, i32, i32) {
    %c0_i32 = arith.constant 0 : i32
    %c0_i32_0 = arith.constant 0 : i32
    %c0_i32_1 = arith.constant 0 : i32
    return %arg0, %c0_i32, %c0_i32_0 : i32, i32, i32
  }
  func.func @transform_1(%arg0: i32) -> (i32, i32, i32) {
    %c0_i32 = arith.constant 0 : i32
    %c0_i32_0 = arith.constant 0 : i32
    %c0_i32_1 = arith.constant 0 : i32
    return %arg0, %c0_i32, %c0_i32_0 : i32, i32, i32
  }
  func.func @transform_2(%arg0: i32) -> (i32, i32) {
    %c0_i32 = arith.constant 0 : i32
    %c0_i32_0 = arith.constant 0 : i32
    %c0_i32_1 = arith.constant 0 : i32
    return %c0_i32, %c0_i32_0 : i32, i32
  }
  func.func @transform_3(%arg0: i32) -> (i32, i32) {
    %c0_i32 = arith.constant 0 : i32
    %c0_i32_0 = arith.constant 0 : i32
    %c0_i32_1 = arith.constant 0 : i32
    return %c0_i32, %c0_i32_0 : i32, i32
  }
  func.func @transform_4(%arg0: i32) -> (i32, i32, i32) {
    %c0_i32 = arith.constant 0 : i32
    %c0_i32_0 = arith.constant 0 : i32
    %c0_i32_1 = arith.constant 0 : i32
    return %arg0, %c0_i32, %c0_i32_0 : i32, i32, i32
  }
  func.func @transform_5(%arg0: i32) -> (i32, i32, i32) {
    %c0_i32 = arith.constant 0 : i32
    %c0_i32_0 = arith.constant 0 : i32
    %c0_i32_1 = arith.constant 0 : i32
    return %arg0, %c0_i32, %c0_i32_0 : i32, i32, i32
  }
}

</mosaic_0001>

<bundles_post_ra>
// kernel: sagpool_forward.1
= control target key start
LH: loop header
LB: loop body
LE: loop exit
PB: predicated region body
PF: predicated region fallthrough
CT: control target
= control target key end

     0   :  { %11 = vsyncpa [#allocation3], 0  ;;  %s3842_s0 = inlined_call_operand.vmem [shape: f32[2,16,16], index: 0, kind: input, shape index: {}]   ;;  %s3843_s1 = inlined_call_operand.vmem [shape: f32[2,16,8], index: 1, kind: input, shape index: {}]   ;;  %s3844_s2 = inlined_call_operand.vmem [shape: f32[8,33], index: 2, kind: input, shape index: {}]   ;;  %s3845_s3 = inlined_call_operand.vmem [shape: f32[1,33], index: 3, kind: input, shape index: {}]   ;;  %s3846_s4 = inlined_call_operand.hbm [shape: f32[2,4,4], index: 4, kind: output, shape index: {0}]   ;;  %s3847_s5 = inlined_call_operand.hbm [shape: f32[2,4,32], index: 5, kind: output, shape index: {1}]  }
   0x1   :  { %13 = vsyncpa [#allocation3 + $0x1], 0 }
   0x2   :  { %14 = vsyncpa [#allocation5], 0 }
   0x3   :  { %16 = vsyncpa [#allocation5 + $0x1], 0  ;;  %s3531_s18 = smov 0   ;;  %s3533_s19 = smov 0  }
   0x4   :  { %s3535_s20 = smov 0   ;;  %s3537_s21 = smov 0  }
   0x5 LB: > { %s3552_s22 = sadd.s32 4294967295, %s3493_s21   ;;  %s2938_s23 = sadd.s32 4294967294, %s3493_s21   ;;  %s3493_s21 = sphi %s3537_s21, %s3853_s21   ;;  %s3489_s20 = sphi %s3535_s20, %s3852_s20   ;;  %s3485_s19 = sphi %s3533_s19, %s3851_s19   ;;  %s3481_s18 = sphi %s3531_s18, %s3850_s18  }
   0x6   : > { %s3556_s24 = sadd.s32 1, %s3493_s21   ;;  %s123_s25 = sadd.s32 1, %s3489_s20 }
   0x7   : > { %s120_s26 = ssub.s32 %s3493_s21, %s3556_s24  ;;  %p133_p0 = scmp.ne.s32.totalorder %s3489_s20, %s3485_s19 }
   0x8   : > { %p121_p1 = scmp.eq.s32.totalorder %s120_s26, 0  ;;  %p134_p2 = scmp.eq.s32.totalorder %s3552_s22, 1 }
   0x9   : > { %p139_p3 = scmp.ne.s32.totalorder %s3485_s19, %s3481_s18  ;;  %p140_p4 = scmp.eq.s32.totalorder %s2938_s23, 1 }
   0xa   : > { %s3567_s27 = scalar_select %p121_p1, %s3489_s20, %s123_s25  }
   0xb   : > { %p3569_p5 = por %p134_p2, %p133_p0  ;;  %p3573_p6 = por %p140_p4, %p139_p3 }
   0xc   : > { %p2941_p7 = scmp.ge.s32.totalorder %s3493_s21, 1  ;;  %p206_p8 = scmp.lt.s32.totalorder %s3493_s21, 3 }
   0xe   : > { %p207_p9 = pnand %p2941_p7, %p206_p8 }
   0xf   : > { %p244_p10 = scmp.lt.s32.totalorder (!%p207_p9), %s3552_s22, 1  ;;  %vm260_vm0 = vcmask (!%p207_p9), 130048   ;;  %v258_v30 = vld [vmem:[%s3844_s2] sm:$0xff] (!%p207_p9)  ;;  %vm775_vm1 = vcmask (!%p207_p9), 64512   ;;  %v3495_v50 = vmov (!%p207_p9), 0.0|0.0   ;;  %v3496_v51 = vmov (!%p207_p9), 32  }
  0x10   : > { %210 = sbr.rel (%p207_p9) target bundleno = 1339 (0x53b), region = 36  ;;  %v783_v31 = vand.u32 (!%p207_p9), 4294901760, %v258_v30  ;;  %3397 = vset.pattern.permute.xlu0 (!%p207_p9), %v3496_v51  ;;  %3398 = vset.pattern.permute.xlu1 (!%p207_p9), %v3496_v51  ;;  %v2948_v54 = vld [vmem:[%s3845_s3] ss:$0 sm:$0xff] (!%p207_p9)  ;;  %vm1282_vm2 = vcmask (!%p207_p9), 269568   ;;  %s3736_s17 = sand.u32 (!%p207_p9), 1, %s3485_s19  }
  0x11   : > { %s2942_s23 = sshll.u32 (!%p207_p9), %s3736_s17, 2  ;;  %s2955_s26 = sshll.u32 (!%p207_p9), %s3552_s22, 6 }
  0x12   : > { %3108 = vmatprep.subr.mxu1 (!%p207_p9), %v783_v31  ;;  %v870_v32 = vsub.f32 (!%p207_p9), %v258_v30, %v783_v31  ;;  %s3741_s25 = scalar_lea.vmem (!%p207_p9), [#allocation4], %s2942_s23  ;;  %s3771_s7 = scalar_lea.hbm (!%p207_p9), %s3847_s5, %s2955_s26 }
  0x13   : > { %3109 = vmatpush3.msra.mxu1 (!%p207_p9), %v783_v31  ;;  %s2835_s8 = sshll.u32 (!%p207_p9), %s3741_s25, 4  ;;  %s3499_s11 = smov (!%p207_p9), [#allocation4]   ;;  %s2836_s8 = int_to_ptr.vmem [resolvable:$true] %s2835_s8 }
  0x14   : > { %v871_v33 = vand.u32 (!%p207_p9), 4294901760, %v870_v32  ;;  %s3399_s10 = scalar_lea.vmem (!%p207_p9), %s2836_s8, 64 }
  0x15   : > { %p3400_p11 = scmp.ne.s32.totalorder (!%p207_p9), %s2836_s8, %s3399_s10 }
  0x16   : > { %3113 = vmatprep.subr.mxu1 (!%p207_p9), %v871_v33  ;;  %v872_v34 = vsub.f32 (!%p207_p9), %v870_v32, %v871_v33 }
  0x17   : > { %s245_s30 = scalar_select %p244_p10, %s3552_s22, 1 }
  0x18   : > { %v873_v35 = vand.u32 4294901760, %v872_v34  ;;  %p3401_p12 = pnand %p3400_p11, %p3569_p5 }
  0x19   : > { %s2959_s6 = sshll.u32 %s245_s30, 4 }
  0x1a   : > { %s253_s9 = scalar_lea.vmem %s3843_s1, %s2959_s6  ;;  %s248_s12 = scalar_lea.vmem %s3842_s0, %s2959_s6 }
  0x1b   : > { %v256_v0 = vld [vmem:[%s253_s9] sm:$0xff]  ;;  %v257_v1 = vld [vmem:[%s253_s9 + $0x8] sm:$0xff]  ;;  %s2809_s9 = scalar_lea.sflag [#allocation5], %s3736_s17  ;;  %p3402_p13 = pneg %p3401_p12 }
  0x1c   : > { %v3587_v2 = vld [vmem:[%s248_s12] sm:$0xff]  ;;  %v268_v3 = vand.u32 4294901760, %v256_v0  ;;  %v271_v4 = vand.u32 4294901760, %v257_v1  ;;  %v3589_v5 = vld [vmem:[%s248_s12 + $0x8] sm:$0xff]  ;;  %s3403_s12 = sshll.u32 %s3499_s11, 4  ;;  %s3404_s12 = int_to_ptr.vmem [resolvable:$false] %s3403_s12 }
  0x1d   : > { %v262_v6 = vsel %vm260_vm0, %v3587_v2, 0  ;;  %v265_v8 = vsel %vm260_vm0, %v3589_v5, 0  ;;  %s3405_s13 = scalar_lea.vmem %s3404_s12, 128  ;;  %p3406_p0 = scmp.lt.s32.totalorder %s2836_s8, %s3404_s12 }
  0x1e   : > { %v334_v7 = vand.u32 4294901760, %v262_v6  ;;  %v3237_v9 = vpack.c.bf16 %v271_v4, %v268_v3  ;;  %v344_v10 = vand.u32 4294901760, %v265_v8  ;;  %v356_v11 = vsub.f32 %v256_v0, %v268_v3  ;;  %p3407_p1 = scmp.lt.s32.totalorder %s3405_s13, %s3399_s10 }
  0x1f   : > { %v363_v12 = vsub.f32 %v257_v1, %v271_v4 }
  0x20   : > { %v335_v13 = vsub.f32 %v262_v6, %v334_v7  ;;  %3238 = vmatprep.subr.bf16.mxu0 %v3237_v9  ;;  %v345_v14 = vsub.f32 %v265_v8, %v344_v10  ;;  %v357_v15 = vand.u32 4294901760, %v356_v11  ;;  %p3408_p2 = por %p3407_p1, %p3406_p0 }
  0x21   : > { %v364_v16 = vand.u32 4294901760, %v363_v12  ;;  %3240 = vmatpush3.bf16.msra.mxu0 %v3237_v9  ;;  %v3245_v28 = vpack.c.bf16 %v363_v12, %v356_v11 }
  0x22   : > { %v336_v17 = vand.u32 4294901760, %v335_v13  ;;  %v346_v18 = vand.u32 4294901760, %v345_v14  ;;  %v358_v19 = vsub.f32 %v356_v11, %v357_v15  ;;  %p3409_p3 = pnand %p3408_p2, %p3402_p13 }
  0x23   : > { %v365_v20 = vsub.f32 %v363_v12, %v364_v16  ;;  %v3253_v29 = vpack.c.bf16 %v364_v16, %v357_v15 }
  0x24   : > { %v337_v21 = vsub.f32 %v335_v13, %v336_v17  ;;  %v347_v22 = vsub.f32 %v345_v14, %v346_v18  ;;  %v359_v23 = vand.u32 4294901760, %v358_v19 }
  0x25   : > { %v366_v24 = vand.u32 4294901760, %v365_v20 }
  0x26   : > { %v338_v25 = vand.u32 4294901760, %v337_v21  ;;  %v348_v26 = vand.u32 4294901760, %v347_v22 }
  0x27   : > { %v3241_v27 = vpack.c.bf16 %v366_v24, %v359_v23 }
  0x28   : > { %3055 = vmatprep.mubr.f32.mxu0 %v338_v25 }
  0x29   : > { %3056 = vmatmul.mubr.f32.vlgmr.msra.gmra.mrb[0].mxu0 %v348_v26  ;;  %3242 = vmatprep.subr.bf16.mxu0 %v3241_v27 }
  0x2a   : > { %3244 = vmatpush3.bf16.msra.mxu0 %v3241_v27  ;;  %3062 = vmatprep.mubr.f32.mxu0 %v334_v7 }
  0x2b   : > { %3246 = vmatprep.subr.bf16.mxu0 %v3245_v28 }
  0x31   : > { %3063 = vmatmul.mubr.f32.vlgmr.msra.gmra.mrb[0].mxu0 %v344_v10 }
  0x32   : > { %3248 = vmatpush3.bf16.msra.mxu0 %v3245_v28  ;;  %3069 = vmatprep.mubr.f32.mxu0 %v335_v13 }
  0x33   : > { %3250 = vmatprep.subr.bf16.mxu0 %v3237_v9 }
  0x39   : > { %3070 = vmatmul.mubr.f32.vlgmr.msra.gmra.mrb[0].mxu0 %v345_v14 }
  0x3a   : > { %3252 = vmatpush3.bf16.msra.mxu0 %v3237_v9  ;;  %3076 = vmatprep.mubr.f32.mxu0 %v336_v17 }
  0x3b   : > { %3254 = vmatprep.subr.bf16.mxu0 %v3253_v29 }
  0x41   : > { %3077 = vmatmul.mubr.f32.vlgmr.msra.gmra.mrb[0].mxu0 %v346_v18 }
  0x42   : > { %3256 = vmatpush3.bf16.msra.mxu0 %v3253_v29  ;;  %3083 = vmatprep.mubr.f32.mxu0 %v334_v7 }
  0x43   : > { %3258 = vmatprep.subr.bf16.mxu0 %v3237_v9 }
  0x49   : > { %3084 = vmatmul.mubr.f32.vlgmr.msra.gmra.mrb[0].mxu0 %v344_v10 }
  0x4a   : > { %3260 = vmatpush3.bf16.msra.mxu0 %v3237_v9  ;;  %3090 = vmatprep.mubr.f32.mxu0 %v334_v7 }
  0x4b   : > { %3093 = vmatprep.subr.mxu0 %v783_v31 }
  0x51   : > { %3091 = vmatmul.mubr.f32.vlgmr.msra.gmra.mrb[0].mxu0 %v344_v10  ;;  %v1277_v10 = vlaneseq }
  0x52   : > { %3094 = vmatpush3.msra.mxu0 %v783_v31 }
  0x53   : > { %3098 = vmatprep.subr.mxu0 %v873_v35  ;;  %v3617_v18 = vshrl.u32 %v1277_v10, 7 }
  0x55   : > { %v3625_v26 = vadd.s32 8, %v3617_v18 }
 0x124   : > { %v3092_v36 = vpop.f32.mrb[0].mxu0 }
 0x125   : > { %v780_v37 = vsel %vm775_vm1, %v3092_v36, 0  ;;  %v759_v38 = vpop.f32.mrb[1].mxu0 }
 0x126   : > { %v858_v39 = vand.u32 4294901760, %v780_v37  ;;  %v777_v40 = vsel %vm775_vm1, %v759_v38, 0 }
 0x127   : > { %v848_v41 = vand.u32 4294901760, %v777_v40 }
 0x128   : > { %v859_v42 = vsub.f32 %v780_v37, %v858_v39 }
 0x129   : > { %v849_v43 = vsub.f32 %v777_v40, %v848_v41 }
 0x12a   : > { %v860_v44 = vand.u32 4294901760, %v859_v42 }
 0x12b   : > { %v850_v45 = vand.u32 4294901760, %v849_v43 }
 0x12c   : > { %v861_v46 = vsub.f32 %v859_v42, %v860_v44 }
 0x12d   : > { %v851_v47 = vsub.f32 %v849_v43, %v850_v45  ;;  %3110 = vmatprep.mubr.f32.mxu1 %v850_v45 }
 0x12e   : > { %3111 = vmatmul.mubr.f32.vlgmr.msra.gmra.mrb[0].mxu1 %v860_v44  ;;  %v862_v49 = vand.u32 4294901760, %v861_v46 }
 0x12f   : > { %3115 = vmatprep.mubr.f32.mxu1 %v848_v41  ;;  %v852_v48 = vand.u32 4294901760, %v851_v47  ;;  %3114 = vmatpush3.msra.mxu1 %v871_v33 }
 0x130   : > { %3118 = vmatprep.subr.mxu1 %v783_v31 }
 0x131   : > { %3095 = vmatprep.mubr.f32.mxu0 %v852_v48 }
 0x132   : > { %3096 = vmatmul.mubr.f32.vlgmr.msra.gmra.mrb[2].mxu0 %v862_v49 }
 0x133   : > { %3100 = vmatprep.mubr.f32.mxu0 %v848_v41  ;;  %3099 = vmatpush3.msra.mxu0 %v873_v35 }
 0x134   : > { %3103 = vmatprep.subr.mxu0 %v870_v32 }
 0x136   : > { %3116 = vmatmul.mubr.f32.vlgmr.msra.gmra.mrb[0].mxu1 %v858_v39 }
 0x137   : > { %3120 = vmatprep.mubr.f32.mxu1 %v848_v41  ;;  %3119 = vmatpush3.msra.mxu1 %v783_v31 }
 0x138   : > { %3261 = vmatprep.subr.bf16.mxu1 %v3495_v50 }
 0x13a   : > { %3101 = vmatmul.mubr.f32.vlgmr.msra.gmra.mrb[2].mxu0 %v858_v39 }
 0x13b   : > { %3105 = vmatprep.mubr.f32.mxu0 %v849_v43  ;;  %3104 = vmatpush3.msra.mxu0 %v870_v32 }
 0x13c   : > { %3279 = vmatprep.subr.bf16.mxu0 %v3495_v50 }
 0x13e   : > { %3121 = vmatmul.mubr.f32.vlgmr.msra.gmra.mrb[0].mxu1 %v858_v39 }
 0x142   : > { %3106 = vmatmul.mubr.f32.vlgmr.msra.gmra.mrb[2].mxu0 %v859_v42 }
 0x211   : > { %v3122_v52 = vpop.f32.mrb[0].mxu1 }
 0x212   : > { %v1261_v53 = vpop.f32.mrb[1].mxu1 }
 0x215   : > { %v3107_v55 = vpop.f32.mrb[2].mxu0 }
 0x216   : > { %v3297_v56 = vadd.f32 %v3107_v55, %v2948_v54  ;;  %v1020_v57 = vpop.f32.mrb[3].mxu0 }
 0x217   : > { %v3299_v58 = vadd.f32 %v2948_v54, %v1020_v57 }
 0x218   : > { %v3298_v59 = vadd.f32 %v3297_v56, %v3122_v52 }
 0x219   : > { %v3300_v60 = vadd.f32 %v3299_v58, %v1261_v53 }
 0x21a   : > { %v1284_v61 = vsel %vm1282_vm2, %v3298_v59, -inf  ;;  %vm1272_vm3 = vcmp.gt.f32.partialorder %v3298_v59, 0.0  ;;  %v1274_v62 = vmul.f32 0.01, %v3298_v59 }
 0x21b   : > { %v1283_v63 = vsel %vm1282_vm2, %v3300_v60, -inf  ;;  %vm1271_vm4 = vcmp.gt.f32.partialorder %v3300_v60, 0.0  ;;  %v1273_v0 = vmul.f32 0.01, %v3300_v60 }
 0x21c   : > { %v1276_v1 = vsel %vm1272_vm3, %v3298_v59, %v1274_v62  ;;  %v1285_v3 = vmax.f32 %v1283_v63, %v1284_v61 }
 0x21d   : > { %v1275_v4 = vsel %vm1271_vm4, %v3300_v60, %v1273_v0  ;;  %v1436_v6 = vand.u32 4294901760, %v1276_v1 }
 0x21e   : > { %v1433_v7 = vand.u32 4294901760, %v1275_v4  ;;  %v1286_v8 = vrot.slane %v1285_v3, 4 }
 0x21f   : > { %v3605_v9 = vsub.f32 %v1276_v1, %v1436_v6 }
 0x220   : > { %v3607_v11 = vpack.c.bf16 %v1436_v6, %v1433_v7  ;;  %v3609_v12 = vsub.f32 %v1275_v4, %v1433_v7  ;;  %v1287_v13 = vmax.f32 %v1285_v3, %v1286_v8 }
 0x221   : > { %v1519_v14 = vand.u32 4294901760, %v3605_v9 }
 0x222   : > { %3263 = vmatpush3.bf16.msra.mxu1 %v3607_v11  ;;  %v1288_v15 = vrot.slane %v1287_v13, 2  ;;  %v1512_v16 = vand.u32 4294901760, %v3609_v12  ;;  %v3268_v17 = vpack.c.bf16 %v3605_v9, %v3609_v12 }
 0x223   : > { %3264 = vmatprep.subr.bf16.mxu1 %v3495_v50  ;;  %v1520_v19 = vsub.f32 %v3605_v9, %v1519_v14 }
 0x224   : > { %v1289_v20 = vmax.f32 %v1287_v13, %v1288_v15  ;;  %v1513_v21 = vsub.f32 %v3609_v12, %v1512_v16  ;;  %v3622_v22 = vpack.c.bf16 %v1519_v14, %v1512_v16 }
 0x225   : > { %v1521_v23 = vand.u32 4294901760, %v1520_v19 }
 0x226   : > { %v1290_v24 = vrot.slane %v1289_v20, 1  ;;  %v1514_v25 = vand.u32 4294901760, %v1513_v21 }
 0x228   : > { %v1291_v27 = vmax.f32 %v1289_v20, %v1290_v24  ;;  %v3627_v28 = vpack.c.bf16 %v1521_v23, %v1514_v25 }
 0x22a   : > { %vm1292_vm5 = vcmp.ge.f32.partialorder %v3300_v60, %v1291_v27  ;;  %vm1293_vm6 = vcmp.ge.f32.partialorder %v3298_v59, %v1291_v27 }
 0x22b   : > { %v1294_v29 = vsel %vm1292_vm5, %v3617_v18, 16  ;;  %v1295_v30 = vsel %vm1293_vm6, %v3625_v26, 16 }
 0x22c   : > { %v1296_v31 = vsel %vm1282_vm2, %v1294_v29, 2147483647  ;;  %v1297_v32 = vsel %vm1282_vm2, %v1295_v30, 2147483647 }
 0x22d   : > { %vm1298_vm7 = vcmp.lt.s32.totalorder %v1296_v31, %v1297_v32 }
 0x22e   : > { %v1299_v33 = vsel %vm1298_vm7, %v1296_v31, %v1297_v32 }
 0x22f   : > { %v1300_v34 = vrot.slane %v1299_v33, 4 }
 0x231   : > { %vm1301_vm8 = vcmp.lt.s32.totalorder %v1299_v33, %v1300_v34 }
 0x232   : > { %v1302_v35 = vsel %vm1301_vm8, %v1299_v33, %v1300_v34 }
 0x233   : > { %v1303_v36 = vrot.slane %v1302_v35, 2 }
 0x235   : > { %vm1304_vm9 = vcmp.lt.s32.totalorder %v1302_v35, %v1303_v36 }
 0x236   : > { %v1305_v37 = vsel %vm1304_vm9, %v1302_v35, %v1303_v36 }
 0x237   : > { %v1306_v38 = vrot.slane %v1305_v37, 1 }
 0x239   : > { %vm1307_vm10 = vcmp.lt.s32.totalorder %v1305_v37, %v1306_v38 }
 0x23a   : > { %v1308_v39 = vsel %vm1307_vm10, %v1305_v37, %v1306_v38 }
 0x23b   : > { %1310 = vperm.xlu0 %3397, %v1308_v39   ;;  %vm1315_vm11 = vcmp.eq.s32.totalorder %v3617_v18, %v1308_v39  ;;  %vm1316_vm12 = vcmp.eq.s32.totalorder %v3625_v26, %v1308_v39 }
 0x23c   : > { %v1317_v40 = vsel %vm1315_vm11, -3.4028235e+38, %v3300_v60  ;;  %v1318_v41 = vsel %vm1316_vm12, -3.4028235e+38, %v3298_v59 }
 0x23d   : > { %v1319_v42 = vsel %vm1282_vm2, %v1317_v40, -inf  ;;  %v1320_v43 = vsel %vm1282_vm2, %v1318_v41, -inf }
 0x23e   : > { %v1321_v44 = vmax.f32 %v1319_v42, %v1320_v43 }
 0x240   : > { %v1322_v45 = vrot.slane %v1321_v44, 4 }
 0x242   : > { %v1323_v46 = vmax.f32 %v1321_v44, %v1322_v45 }
 0x244   : > { %v1324_v47 = vrot.slane %v1323_v46, 2 }
 0x246   : > { %v1325_v48 = vmax.f32 %v1323_v46, %v1324_v47 }
 0x248   : > { %v1326_v49 = vrot.slane %v1325_v48, 1 }
 0x24a   : > { %v1327_v51 = vmax.f32 %v1325_v48, %v1326_v49 }
 0x24c   : > { %vm1328_vm13 = vcmp.ge.f32.partialorder %v1317_v40, %v1327_v51  ;;  %vm1329_vm14 = vcmp.ge.f32.partialorder %v1318_v41, %v1327_v51 }
 0x24d   : > { %v1330_v52 = vsel %vm1328_vm13, %v3617_v18, 16  ;;  %v1331_v53 = vsel %vm1329_vm14, %v3625_v26, 16 }
 0x24e   : > { %v1332_v54 = vsel %vm1282_vm2, %v1330_v52, 2147483647  ;;  %v1333_v55 = vsel %vm1282_vm2, %v1331_v53, 2147483647 }
 0x24f   : > { %vm1334_vm15 = vcmp.lt.s32.totalorder %v1332_v54, %v1333_v55 }
 0x250   : > { %v1335_v56 = vsel %vm1334_vm15, %v1332_v54, %v1333_v55  ;;  %v3498_v55 = vmov 0.0  }
 0x251   : > { %v1336_v57 = vrot.slane %v1335_v56, 4 }
 0x253   : > { %vm1337_vm1 = vcmp.lt.s32.totalorder %v1335_v56, %v1336_v57 }
 0x254   : > { %v1338_v58 = vsel %vm1337_vm1, %v1335_v56, %v1336_v57 }
 0x255   : > { %v1339_v59 = vrot.slane %v1338_v58, 2 }
 0x257   : > { %vm1340_vm3 = vcmp.lt.s32.totalorder %v1338_v58, %v1339_v59 }
 0x258   : > { %v1341_v60 = vsel %vm1340_vm3, %v1338_v58, %v1339_v59 }
 0x259   : > { %v1342_v61 = vrot.slane %v1341_v60, 1 }
 0x25b   : > { %vm1343_vm4 = vcmp.lt.s32.totalorder %v1341_v60, %v1342_v61 }
 0x25c   : > { %v1344_v62 = vsel %vm1343_vm4, %v1341_v60, %v1342_v61 }
 0x25d   : > { %1346 = vperm.xlu0 %3397, %v1344_v62   ;;  %vm1351_vm5 = vcmp.eq.s32.totalorder %v3617_v18, %v1344_v62  ;;  %vm1352_vm6 = vcmp.eq.s32.totalorder %v3625_v26, %v1344_v62 }
 0x25e   : > { %v1353_v63 = vsel %vm1351_vm5, -3.4028235e+38, %v1317_v40  ;;  %v1354_v0 = vsel %vm1352_vm6, -3.4028235e+38, %v1318_v41 }
 0x25f   : > { %v1355_v1 = vsel %vm1282_vm2, %v1353_v63, -inf  ;;  %v1356_v3 = vsel %vm1282_vm2, %v1354_v0, -inf }
 0x260   : > { %v1357_v4 = vmax.f32 %v1355_v1, %v1356_v3 }
 0x262   : > { %v1358_v6 = vrot.slane %v1357_v4, 4 }
 0x264   : > { %v1359_v7 = vmax.f32 %v1357_v4, %v1358_v6 }
 0x266   : > { %v1360_v8 = vrot.slane %v1359_v7, 2 }
 0x268   : > { %v1361_v13 = vmax.f32 %v1359_v7, %v1360_v8  ;;  %v1281_v8 = vand.u32 127, %v1277_v10 }
 0x26a   : > { %v1362_v14 = vrot.slane %v1361_v13, 1 }
 0x26c   : > { %v1363_v15 = vmax.f32 %v1361_v13, %v1362_v14 }
 0x26e   : > { %vm1364_vm7 = vcmp.ge.f32.partialorder %v1353_v63, %v1363_v15  ;;  %vm1365_vm8 = vcmp.ge.f32.partialorder %v1354_v0, %v1363_v15 }
 0x26f   : > { %v1366_v16 = vsel %vm1364_vm7, %v3617_v18, 16  ;;  %v1367_v19 = vsel %vm1365_vm8, %v3625_v26, 16  ;;  %vm3497_vm7 = vmmov 0  }
 0x270   : > { %v1368_v20 = vsel %vm1282_vm2, %v1366_v16, 2147483647  ;;  %v1369_v21 = vsel %vm1282_vm2, %v1367_v19, 2147483647  ;;  %3127 = vmatprep.mubr.msk.f32.mxu1 %vm3497_vm7, %v3498_v55  ;;  %3169 = vmatprep.mubr.msk.f32.mxu0 %vm3497_vm7, %v3498_v55 }
 0x271   : > { %vm1370_vm9 = vcmp.lt.s32.totalorder %v1368_v20, %v1369_v21 }
 0x272   : > { %v1371_v23 = vsel %vm1370_vm9, %v1368_v20, %v1369_v21 }
 0x273   : > { %v1372_v24 = vrot.slane %v1371_v23, 4 }
 0x275   : > { %vm1373_vm10 = vcmp.lt.s32.totalorder %v1371_v23, %v1372_v24 }
 0x276   : > { %v1374_v25 = vsel %vm1373_vm10, %v1371_v23, %v1372_v24  ;;  %vm1423_vm10 = vcmask 1040384  }
 0x277   : > { %v1375_v27 = vrot.slane %v1374_v25, 2 }
 0x279   : > { %vm1376_vm11 = vcmp.lt.s32.totalorder %v1374_v25, %v1375_v27 }
 0x27a   : > { %v1377_v29 = vsel %vm1376_vm11, %v1374_v25, %v1375_v27  ;;  %vm1425_vm11 = vcmask 1041408  }
 0x27b   : > { %v1378_v30 = vrot.slane %v1377_v29, 1 }
 0x27d   : > { %vm1379_vm12 = vcmp.lt.s32.totalorder %v1377_v29, %v1378_v30 }
 0x27e   : > { %v1380_v31 = vsel %vm1379_vm12, %v1377_v29, %v1378_v30  ;;  %vm1427_vm12 = vcmask 1042432  }
 0x27f   : > { %1382 = vperm.xlu1 %3398, %v1380_v31   ;;  %vm1387_vm13 = vcmp.eq.s32.totalorder %v3617_v18, %v1380_v31  ;;  %vm1388_vm14 = vcmp.eq.s32.totalorder %v3625_v26, %v1380_v31 }
 0x280   : > { %v1389_v32 = vsel %vm1387_vm13, -3.4028235e+38, %v1353_v63  ;;  %v1390_v33 = vsel %vm1388_vm14, -3.4028235e+38, %v1354_v0  ;;  %vm1891_vm14 = vcmask 257024  }
 0x281   : > { %v1391_v34 = vsel %vm1282_vm2, %v1389_v32, -inf  ;;  %v1392_v35 = vsel %vm1282_vm2, %v1390_v33, -inf }
 0x282   : > { %v1393_v36 = vmax.f32 %v1391_v34, %v1392_v35 }
 0x284   : > { %v1394_v37 = vrot.slane %v1393_v36, 4 }
 0x286   : > { %v1395_v38 = vmax.f32 %v1393_v36, %v1394_v37 }
 0x288   : > { %v1396_v39 = vrot.slane %v1395_v38, 2 }
 0x28a   : > { %v1397_v40 = vmax.f32 %v1395_v38, %v1396_v39 }
 0x28c   : > { %v1398_v41 = vrot.slane %v1397_v40, 1 }
 0x28e   : > { %v1399_v42 = vmax.f32 %v1397_v40, %v1398_v41 }
 0x290   : > { %vm1400_vm15 = vcmp.ge.f32.partialorder %v1389_v32, %v1399_v42  ;;  %vm1401_vm1 = vcmp.ge.f32.partialorder %v1390_v33, %v1399_v42 }
 0x291   : > { %v1402_v43 = vsel %vm1400_vm15, %v3617_v18, 16  ;;  %v1403_v44 = vsel %vm1401_vm1, %v3625_v26, 16  ;;  %v1894_v18 = vand.u32 4294901760, %v3587_v2  ;;  %v1897_v26 = vand.u32 4294901760, %v3589_v5 }
 0x292   : > { %v1404_v45 = vsel %vm1282_vm2, %v1402_v43, 2147483647  ;;  %v1405_v46 = vsel %vm1282_vm2, %v1403_v44, 2147483647 }
 0x293   : > { %vm1406_vm3 = vcmp.lt.s32.totalorder %v1404_v45, %v1405_v46  ;;  %v3663_v56 = vpack.c.bf16 %v1897_v26, %v1894_v18  ;;  %v1972_v57 = vsub.f32 %v3587_v2, %v1894_v18  ;;  %v1979_v58 = vsub.f32 %v3589_v5, %v1897_v26 }
 0x294   : > { %v1407_v47 = vsel %vm1406_vm3, %v1404_v45, %v1405_v46 }
 0x295   : > { %v1408_v48 = vrot.slane %v1407_v47, 4  ;;  %3281 = vmatpush3.bf16.msra.mxu0 %v3663_v56  ;;  %v1973_v59 = vand.u32 4294901760, %v1972_v57  ;;  %v1980_v60 = vand.u32 4294901760, %v1979_v58  ;;  %v3286_v3 = vpack.c.bf16 %v1979_v58, %v1972_v57 }
 0x296   : > { %3282 = vmatprep.subr.bf16.mxu0 %v3495_v50 }
 0x297   : > { %vm1409_vm4 = vcmp.lt.s32.totalorder %v1407_v47, %v1408_v48  ;;  %v1974_v61 = vsub.f32 %v1972_v57, %v1973_v59  ;;  %v1981_v62 = vsub.f32 %v1979_v58, %v1980_v60  ;;  %v3292_v4 = vpack.c.bf16 %v1980_v60, %v1973_v59 }
 0x298   : > { %v1410_v49 = vsel %vm1409_vm4, %v1407_v47, %v1408_v48 }
 0x299   : > { %v1411_v51 = vrot.slane %v1410_v49, 2  ;;  %v1975_v63 = vand.u32 4294901760, %v1974_v61  ;;  %v1982_v0 = vand.u32 4294901760, %v1981_v62 }
 0x29b   : > { %vm1412_vm5 = vcmp.lt.s32.totalorder %v1410_v49, %v1411_v51  ;;  %v3283_v1 = vpack.c.bf16 %v1982_v0, %v1975_v63 }
 0x29c   : > { %v1413_v52 = vsel %vm1412_vm5, %v1410_v49, %v1411_v51 }
 0x29d   : > { %v1414_v53 = vrot.slane %v1413_v52, 1 }
 0x29f   : > { %vm1415_vm6 = vcmp.lt.s32.totalorder %v1413_v52, %v1414_v53 }
 0x2a0   : > { %v1416_v54 = vsel %vm1415_vm6, %v1413_v52, %v1414_v53 }
 0x2a1   : > { %1418 = vperm.xlu1 %3398, %v1416_v54  }
 0x2ba   : > { %v1311_v6 = vpop.permute.xlu0 %1310 }
 0x2bb   : > { %vm1312_vm9 = vcmp.eq.s32.totalorder %v1281_v8, %v1311_v6 }
 0x2bc   : > { %v2949_v14 = vsel %vm1312_vm9, 1.0, %v3498_v55 }
 0x2dc   : > { %v1347_v7 = vpop.permute.xlu0 %1346 }
 0x2dd   : > { %vm1348_vm2 = vcmp.eq.s32.totalorder %v1281_v8, %v1347_v7 }
 0x2de   : > { %v2950_v5 = vsel %vm1348_vm2, 1.0, %v3498_v55 }
 0x2df   : > { %v1424_v16 = vsel %vm1423_vm10, %v2949_v14, %v2950_v5 }
 0x2fe   : > { %v1383_v2 = vpop.permute.xlu1 %1382 }
 0x2ff   : > { %vm1384_vm8 = vcmp.eq.s32.totalorder %v1281_v8, %v1383_v2 }
 0x300   : > { %v2951_v13 = vsel %vm1384_vm8, 1.0, %v3498_v55 }
 0x301   : > { %v1426_v19 = vsel %vm1425_vm11, %v1424_v16, %v2951_v13 }
 0x320   : > { %v1419_v15 = vpop.permute.xlu1 %1418 }
 0x321   : > { %vm1420_vm13 = vcmp.eq.s32.totalorder %v1281_v8, %v1419_v15 }
 0x322   : > { %v2952_v20 = vsel %vm1420_vm13, 1.0, %v3498_v55 }
 0x323   : > { %v1428_v10 = vsel %vm1427_vm12, %v1426_v19, %v2952_v20 }
 0x324   : > { %v1430_v21 = vsel %vm260_vm0, %v1428_v10, 0 }
 0x325   : > { %v3675_v23 = vand.u32 4294901760, %v1430_v21 }
 0x327   : > { %v3678_v24 = vsub.f32 %v1430_v21, %v3675_v23 }
 0x329   : > { %v3681_v25 = vand.u32 4294901760, %v3678_v24 }
 0x32b   : > { %v1502_v27 = vsub.f32 %v3678_v24, %v3681_v25 }
 0x32d   : > { %v1503_v29 = vand.u32 4294901760, %v1502_v27 }
 0x32f   : > { %3128 = vmatmul.mubr.f32.vlgmr.msra.gmra.mrb[2].mxu1 %v1503_v29  ;;  %3170 = vmatmul.mubr.f32.vlgmr.msra.gmra.mrb[4].mxu0 %v1503_v29 }
 0x330   : > { %3266 = vmatpush3.bf16.msra.mxu1 %v3627_v28  ;;  %3284 = vmatpush3.bf16.msra.mxu0 %v3283_v1 }
 0x331   : > { %3134 = vmatprep.mubr.msk.f32.mxu1 %vm3497_vm7, %v3498_v55  ;;  %3267 = vmatprep.subr.bf16.mxu1 %v3495_v50 }
 0x332   : > { %3176 = vmatprep.mubr.msk.f32.mxu0 %vm3497_vm7, %v3498_v55  ;;  %3285 = vmatprep.subr.bf16.mxu0 %v3495_v50 }
 0x337   : > { %3135 = vmatmul.mubr.f32.vlgmr.msra.gmra.mrb[2].mxu1 %v3675_v23  ;;  %3177 = vmatmul.mubr.f32.vlgmr.msra.gmra.mrb[4].mxu0 %v3675_v23 }
 0x338   : > { %3269 = vmatpush3.bf16.msra.mxu1 %v3268_v17  ;;  %3287 = vmatpush3.bf16.msra.mxu0 %v3286_v3 }
 0x339   : > { %3141 = vmatprep.mubr.msk.f32.mxu1 %vm3497_vm7, %v3498_v55  ;;  %3270 = vmatprep.subr.bf16.mxu1 %v3495_v50 }
 0x33a   : > { %3183 = vmatprep.mubr.msk.f32.mxu0 %vm3497_vm7, %v3498_v55  ;;  %3288 = vmatprep.subr.bf16.mxu0 %v3495_v50 }
 0x33f   : > { %3142 = vmatmul.mubr.f32.vlgmr.msra.gmra.mrb[2].mxu1 %v3678_v24  ;;  %3184 = vmatmul.mubr.f32.vlgmr.msra.gmra.mrb[4].mxu0 %v3678_v24 }
 0x340   : > { %3272 = vmatpush3.bf16.msra.mxu1 %v3607_v11  ;;  %3290 = vmatpush3.bf16.msra.mxu0 %v3663_v56 }
 0x341   : > { %3148 = vmatprep.mubr.msk.f32.mxu1 %vm3497_vm7, %v3498_v55  ;;  %3273 = vmatprep.subr.bf16.mxu1 %v3495_v50 }
 0x342   : > { %3190 = vmatprep.mubr.msk.f32.mxu0 %vm3497_vm7, %v3498_v55  ;;  %3291 = vmatprep.subr.bf16.mxu0 %v3495_v50 }
 0x347   : > { %3149 = vmatmul.mubr.f32.vlgmr.msra.gmra.mrb[2].mxu1 %v3681_v25  ;;  %3191 = vmatmul.mubr.f32.vlgmr.msra.gmra.mrb[4].mxu0 %v3681_v25 }
 0x348   : > { %3275 = vmatpush3.bf16.msra.mxu1 %v3622_v22  ;;  %3293 = vmatpush3.bf16.msra.mxu0 %v3292_v4 }
 0x349   : > { %3155 = vmatprep.mubr.msk.f32.mxu1 %vm3497_vm7, %v3498_v55  ;;  %3276 = vmatprep.subr.bf16.mxu1 %v3495_v50 }
 0x34a   : > { %3197 = vmatprep.mubr.msk.f32.mxu0 %vm3497_vm7, %v3498_v55  ;;  %3294 = vmatprep.subr.bf16.mxu0 %v3495_v50 }
 0x34f   : > { %3156 = vmatmul.mubr.f32.vlgmr.msra.gmra.mrb[2].mxu1 %v3675_v23  ;;  %3198 = vmatmul.mubr.f32.vlgmr.msra.gmra.mrb[4].mxu0 %v3675_v23 }
 0x350   : > { %3278 = vmatpush3.bf16.msra.mxu1 %v3607_v11  ;;  %3296 = vmatpush3.bf16.msra.mxu0 %v3663_v56 }
 0x351   : > { %3162 = vmatprep.mubr.msk.f32.mxu1 %vm3497_vm7, %v3498_v55  ;;  %3204 = vmatprep.mubr.msk.f32.mxu0 %vm3497_vm7, %v3498_v55 }
 0x352   : > { %3207 = vmatprep.subr.mxu1 %v3498_v55 }
 0x357   : > { %3163 = vmatmul.mubr.f32.vlgmr.msra.gmra.mrb[2].mxu1 %v3675_v23  ;;  %3205 = vmatmul.mubr.f32.vlgmr.msra.gmra.mrb[4].mxu0 %v3675_v23 }
 0x358   : > { %3209 = vmatprep.mubr.msk.f32.mxu1 %vm3497_vm7, %v3498_v55 }
 0x42a   : > { %v1887_v50 = vpop.f32.mrb[2].mxu1  ;;  %v2348_v9 = vpop.f32.mrb[4].mxu0 }
 0x42b   : > { %1892 = vst.msk [vmem:[%s3741_s25] sm:$0xf] %vm1891_vm14, %v1887_v50  ;;  %v2353_v11 = vsel %vm260_vm0, %v2348_v9, 0  ;;  %v3164_v12 = vpop.f32.mrb[3].mxu1  ;;  %v3206_v17 = vpop.f32.mrb[5].mxu0 }
 0x42c   : > { %v2356_v22 = vand.u32 4294901760, %v2353_v11 }
 0x42e   : > { %v2433_v28 = vsub.f32 %v2353_v11, %v2356_v22  ;;  %3208 = vmatpush3.xpose.msra.mxu1 %v2356_v22 }
 0x42f   : > { %3212 = vmatprep.subr.mxu1 %v3498_v55 }
 0x430   : > { %v2434_v30 = vand.u32 4294901760, %v2433_v28 }
 0x431   : > { %3210 = vmatmul.mubr.f32.vlgmr.msra.gmra.mrb[4].mxu1 %v1503_v29 }
 0x432   : > { %v2435_v31 = vsub.f32 %v2433_v28, %v2434_v30  ;;  %3214 = vmatprep.mubr.msk.f32.mxu1 %vm3497_vm7, %v3498_v55 }
 0x434   : > { %v2436_v32 = vand.u32 4294901760, %v2435_v31 }
 0x436   : > { %3213 = vmatpush3.xpose.msra.mxu1 %v2436_v32 }
 0x437   : > { %3217 = vmatprep.subr.mxu1 %v3498_v55 }
 0x439   : > { %3215 = vmatmul.mubr.f32.vlgmr.msra.gmra.mrb[4].mxu1 %v3675_v23 }
 0x43a   : > { %3218 = vmatpush3.xpose.msra.mxu1 %v2433_v28  ;;  %3219 = vmatprep.mubr.msk.f32.mxu1 %vm3497_vm7, %v3498_v55 }
 0x43b   : > { %3222 = vmatprep.subr.mxu1 %v3498_v55 }
 0x441   : > { %3220 = vmatmul.mubr.f32.vlgmr.msra.gmra.mrb[4].mxu1 %v3678_v24 }
 0x442   : > { %3223 = vmatpush3.xpose.msra.mxu1 %v2356_v22  ;;  %3224 = vmatprep.mubr.msk.f32.mxu1 %vm3497_vm7, %v3498_v55 }
 0x443   : > { %3227 = vmatprep.subr.mxu1 %v3498_v55 }
 0x449   : > { %3225 = vmatmul.mubr.f32.vlgmr.msra.gmra.mrb[4].mxu1 %v3681_v25 }
 0x44a   : > { %3228 = vmatpush3.xpose.msra.mxu1 %v2434_v30  ;;  %3229 = vmatprep.mubr.msk.f32.mxu1 %vm3497_vm7, %v3498_v55 }
 0x44b   : > { %3232 = vmatprep.subr.mxu1 %v3498_v55 }
 0x451   : > { %3230 = vmatmul.mubr.f32.vlgmr.msra.gmra.mrb[4].mxu1 %v3675_v23 }
 0x452   : > { %3233 = vmatpush3.xpose.msra.mxu1 %v2356_v22  ;;  %3234 = vmatprep.mubr.msk.f32.mxu1 %vm3497_vm7, %v3498_v55 }
 0x459   : > { %3235 = vmatmul.mubr.f32.vlgmr.msra.gmra.mrb[4].mxu1 %v3675_v23 }
 0x45a   : > { %3412 = shalt.err (!%p3409_p3)
}
 0x45b   : > { %s3413_s14 = scalar_lea.hbm %s3771_s7, 64  ;;  %s3417_s25 = scalar_lea.hbm %s3847_s5, 128 }
 0x45c   : > { %p3414_p4 = scmp.ne.s32.totalorder %s3771_s7, %s3413_s14  ;;  %p3418_p9 = scmp.lt.u32.totalorder %s3771_s7, %s3847_s5 }
 0x45d   : > { %p3419_p10 = scmp.lt.u32.totalorder %s3417_s25, %s3413_s14  ;;  %p3421_p12 = scmp.lt.u32.totalorder %s3413_s14, %s3771_s7 }
 0x45e   : > { %p3415_p7 = pnand %p3414_p4, %p3569_p5 }
 0x45f   : > { %p3420_p11 = por %p3419_p10, %p3418_p9 }
 0x460   : > { %p3416_p8 = pneg %p3415_p7 }
 0x461   : > { %p3422_p13 = por %p3421_p12, %p3420_p11 }
 0x463   : > { %p3423_p0 = pnand %p3422_p13, %p3416_p8 }
 0x465   : > { %3426 = shalt.err (!%p3423_p0)
}
 0x466   : > { %3350 = dma.vmem_to_hbm [thread:$0]  (%p3569_p5), %s2836_s8, 64, %s3771_s7, %s2809_s9   ;;  %vm2801_vm0 = vcmask 27648  }
 0x467   : > { %s236_s10 = scalar_lea.vmem [#allocation2], %s2942_s23  ;;  %s3799_s14 = scalar_lea.hbm %s3846_s4, %s2955_s26 }
 0x468   : > { %s2822_s11 = sshll.u32 %s236_s10, 4  ;;  %s2804_s15 = scalar_lea.sflag [#allocation3], %s3736_s17  ;;  %s3801_s11 = int_to_ptr.vmem [resolvable:$true] %s2822_s11 }
 0x469   : > { %s3427_s7 = scalar_lea.vmem %s3801_s11, 64  ;;  %s3500_s22 = smov [#allocation2]  }
 0x46a   : > { %p3428_p1 = scmp.ne.s32.totalorder %s3801_s11, %s3427_s7  ;;  %s3431_s23 = sshll.u32 %s3500_s22, 4  ;;  %s3432_s23 = int_to_ptr.vmem [resolvable:$false] %s3431_s23 }
 0x46b   : > { %s3433_s8 = scalar_lea.vmem %s3432_s23, 128  ;;  %p3434_p4 = scmp.lt.s32.totalorder %s3801_s11, %s3432_s23 }
 0x46c   : > { %p3429_p2 = pnand %p3428_p1, %p3569_p5  ;;  %p3435_p7 = scmp.lt.s32.totalorder %s3433_s8, %s3427_s7 }
 0x46e   : > { %p3430_p3 = pneg %p3429_p2  ;;  %p3436_p8 = por %p3435_p7, %p3434_p4 }
 0x470   : > { %p3437_p9 = pnand %p3436_p8, %p3430_p3 }
 0x52c   : > { %v2797_v33 = vpop.f32.mrb[4].mxu1 }
 0x52d   : > { %2802 = vst.msk [vmem:[%s236_s10] sm:$0xf] %vm2801_vm0, %v2797_v33  ;;  %v3236_v34 = vpop.f32.mrb[5].mxu1 }
 0x52e   : > { %3440 = shalt.err (!%p3437_p9)
}
 0x52f   : > { %s3441_s17 = scalar_lea.hbm %s3799_s14, 64  ;;  %s3445_s16 = scalar_lea.hbm %s3846_s4, 128 }
 0x530   : > { %p3442_p10 = scmp.ne.s32.totalorder %s3799_s14, %s3441_s17  ;;  %p3446_p13 = scmp.lt.u32.totalorder %s3799_s14, %s3846_s4 }
 0x531   : > { %p3447_p0 = scmp.lt.u32.totalorder %s3445_s16, %s3441_s17  ;;  %p3449_p2 = scmp.lt.u32.totalorder %s3441_s17, %s3799_s14 }
 0x532   : > { %p3443_p11 = pnand %p3442_p10, %p3569_p5 }
 0x533   : > { %p3448_p1 = por %p3447_p0, %p3446_p13 }
 0x534   : > { %p3444_p12 = pneg %p3443_p11 }
 0x535   : > { %p3450_p3 = por %p3449_p2, %p3448_p1 }
 0x537   : > { %p3451_p4 = pnand %p3450_p3, %p3444_p12 }
 0x539   : > { %3454 = shalt.err (!%p3451_p4)
}
 0x53a   : > { %3349 = dma.vmem_to_hbm [thread:$0]  (%p3569_p5), %s3801_s11, 64, %s3799_s14, %s2804_s15  }
 0x53b PF: > { %p3360_p7 = scmp.ge.s32.totalorder %s3493_s21, 2  ;;  %s2847_s6 = sand.u32 1, %s3481_s18  }
 0x53c   : > { %s2848_s10 = scalar_lea.sflag [#allocation3], %s2847_s6 }
 0x53d   : > { %p3354_p8 = pnand %p3360_p7, %p3573_p6 }
 0x53f   : > { %3472 = dma.done.wait (!%p3354_p8), %s2848_s10, 64  }
 0x540   : > { %3474 = vsyncadd (!%p3354_p8), %s2848_s10, 4294967232  ;;  %s2857_s12 = scalar_lea.sflag [#allocation5], %s2847_s6 }
 0x541   : > { %3476 = dma.done.wait (!%p3354_p8), %s2857_s12, 64  }
 0x542   : > { %3478 = vsyncadd (!%p3354_p8), %s2857_s12, 4294967232  ;;  %p19_p5 = scmp.ge.s32.totalorder %s3556_s24, 4   ;;  %s3850_s18 = smov %s3485_s19 }
 0x543   : > { %s3851_s19 = smov %s3489_s20  ;;  %s3852_s20 = smov %s3567_s27 }
 0x544   : > { %s3853_s21 = smov %s3556_s24  ;;  %21 = sbr.rel (!%p19_p5) target bundleno = 5 (0x5), region = 91 }
 0x54b   :  { %2862 = vsyncpa [#allocation3], 1 }
 0x54c   :  { %2864 = vsyncpa [#allocation3 + $0x1], 1 }
 0x54d   :  { %2865 = vsyncpa [#allocation5], 1 }
 0x54e   :  { %2867 = vsyncpa [#allocation5 + $0x1], 1 }

</bundles_post_ra>
